<compile_context>
chip_gen: v5e
topology: v5e:2x2
jax: 0.10.0
libtpu: 0.0.40
codegen_flags: <defaults>
</compile_context>

<pallas_src>
import functools
import math

import jax
import jax.numpy as jnp
from jax.experimental import pallas as pl
from jax.experimental.pallas import tpu as pltpu


def _round_up(n: int, m: int) -> int:
    return ((n + m - 1) // m) * m


def _input_linear_kernel(x_ref, w_ref, b_ref, gamma_ref, beta_ref, pe_ref,
                         o_ref, *, eps):
    # x_ref: (tm, idim)  w_ref: (idim, odim)  b/gamma/beta: (1, odim)
    # pe_ref: (tm, odim) o_ref: (tm, odim)
    # Matmul on native dtypes (bf16 is MXU-native); accumulate in f32.
    y = jnp.dot(x_ref[...], w_ref[...], preferred_element_type=jnp.float32)
    y = y + b_ref[...].astype(jnp.float32)

    # LayerNorm over odim, eps = 1e-12, in f32.
    mean = jnp.mean(y, axis=-1, keepdims=True)
    c = y - mean
    var = jnp.mean(c * c, axis=-1, keepdims=True)
    yn = c * jax.lax.rsqrt(var + eps)

    # gamma/beta arrive pre-scaled by sqrt(odim); PE is added unscaled on top.
    out = (yn * gamma_ref[...].astype(jnp.float32)
           + beta_ref[...].astype(jnp.float32)
           + pe_ref[...].astype(jnp.float32))
    o_ref[...] = out.astype(o_ref.dtype)


@functools.lru_cache(maxsize=8)
def make_sinusoidal_pe(max_len: int, d_model: int):
    """espnet-style absolute sinusoidal positional encoding, (max_len, d_model)."""
    position = jnp.arange(max_len, dtype=jnp.float32)[:, None]
    div_term = jnp.exp(
        jnp.arange(0, d_model, 2, dtype=jnp.float32)
        * -(math.log(10000.0) / d_model))
    angles = position * div_term
    pe = jnp.zeros((max_len, d_model), dtype=jnp.float32)
    pe = pe.at[:, 0::2].set(jnp.sin(angles))
    pe = pe.at[:, 1::2].set(jnp.cos(angles)[:, : d_model // 2])  # handles odd d_model
    return pe


def input_linear_forward(x, x_mask, params, *, tm=256):
    """x: (B, T, idim), x_mask: (B, 1, T). Returns (y, x_mask), y: (B, T, odim)."""
    B, T, idim = x.shape
    w = params["w"]            # (idim, odim)
    b = params["b"]            # (odim,)
    gamma = params["gamma"]    # (odim,)
    beta = params["beta"]      # (odim,)
    odim = w.shape[1]
    xscale = float(math.sqrt(odim))

    # Fold PositionalEncoding's sqrt(odim) scale into the LayerNorm affine.
    gamma_s = (gamma.astype(jnp.float32) * xscale).reshape(1, odim)
    beta_s = (beta.astype(jnp.float32) * xscale).reshape(1, odim)
    b2 = b.reshape(1, odim)

    # Row tile: large for real workloads; shrink + pad for short sequences.
    tm_eff = min(tm, _round_up(T, 8))
    T_pad = _round_up(T, tm_eff)
    if T_pad != T:
        x = jnp.pad(x, ((0, 0), (0, T_pad - T), (0, 0)))

    pe = make_sinusoidal_pe(T_pad, odim)   # (T_pad, odim) — no per-batch broadcast

    kernel = functools.partial(_input_linear_kernel, eps=1e-12)

    itm = x.dtype.itemsize
    vmem_need = 2 * (tm_eff * idim * itm                 # x tile (double-buffered)
                     + idim * odim * w.dtype.itemsize    # resident W
                     + tm_eff * odim * 4                 # PE tile
                     + tm_eff * odim * itm               # output tile
                     + 3 * odim * 4)                     # bias/gamma/beta
    vmem_limit = int(min(48 * 1024 * 1024, max(8 * 1024 * 1024, 4 * vmem_need)))

    y_pad = pl.pallas_call(
        kernel,
        out_shape=jax.ShapeDtypeStruct((B, T_pad, odim), x.dtype),
        grid_spec=pltpu.PrefetchScalarGridSpec(
            num_scalar_prefetch=0,
            # time outer, batch inner: PE block index constant over inner steps
            # so its DMA is skipped between consecutive grid iterations.
            grid=(T_pad // tm_eff, B),
            in_specs=[
                pl.BlockSpec((None, tm_eff, idim), lambda t, b: (b, t, 0)),  # x
                pl.BlockSpec((idim, odim), lambda t, b: (0, 0)),             # W (resident)
                pl.BlockSpec((1, odim), lambda t, b: (0, 0)),                # bias
                pl.BlockSpec((1, odim), lambda t, b: (0, 0)),                # gamma*sqrt(odim)
                pl.BlockSpec((1, odim), lambda t, b: (0, 0)),                # beta*sqrt(odim)
                pl.BlockSpec((tm_eff, odim), lambda t, b: (t, 0)),           # PE rows
            ],
            out_specs=pl.BlockSpec((None, tm_eff, odim), lambda t, b: (b, t, 0)),
        ),
        compiler_params=pltpu.CompilerParams(
            dimension_semantics=("parallel", "parallel"),
            vmem_limit_bytes=vmem_limit,
        ),
    )(x, w, b2, gamma_s, beta_s, pe)

    y = y_pad[:, :T, :] if T_pad != T else y_pad
    # TODO(synk): Dropout is identity at inference (eval mode); no in-kernel RNG.
    return y, x_mask


def init_params(key, idim, odim):
    k_w, k_b = jax.random.split(key)
    bound = 1.0 / math.sqrt(idim)
    w = jax.random.uniform(k_w, (idim, odim), jnp.float32, -bound, bound)
    b = jax.random.uniform(k_b, (odim,), jnp.float32, -bound, bound)
    gamma = jnp.ones((odim,), jnp.float32)   # LayerNorm weight
    beta = jnp.zeros((odim,), jnp.float32)   # LayerNorm bias
    return {"w": w, "b": b, "gamma": gamma, "beta": beta}


def _ref_forward(x, x_mask, params):
    """Pure-JAX reference for correctness checking."""
    w, b = params["w"], params["b"]
    gamma, beta = params["gamma"], params["beta"]
    odim = w.shape[1]
    y = jnp.einsum("bti,io->bto", x, w) + b
    mean = jnp.mean(y, axis=-1, keepdims=True)
    var = jnp.mean((y - mean) ** 2, axis=-1, keepdims=True)
    yn = (y - mean) / jnp.sqrt(var + 1e-12) * gamma + beta
    pe = make_sinusoidal_pe(x.shape[1], odim)
    return yn * math.sqrt(odim) + pe[None, :, :], x_mask


if __name__ == "__main__":
    # Small shapes consistent with the module; T=12 exercises the padding path
    # (tile rounds up to 16 internally, result is sliced back to 12).
    B, T, idim, odim = 2, 12, 32, 32
    key = jax.random.PRNGKey(0)
    k_x, k_p = jax.random.split(key)
    x = jax.random.normal(k_x, (B, T, idim), jnp.float32)
    x_mask = jnp.ones((B, 1, T), dtype=jnp.bool_)
    params = init_params(k_p, idim, odim)

    y, mask_out = input_linear_forward(x, x_mask, params)
    jax.block_until_ready(y)

    y_ref, _ = _ref_forward(x, x_mask, params)
    assert y.shape == (B, T, odim)
    assert mask_out.shape == (B, 1, T)
    assert jnp.allclose(y, y_ref, atol=1e-4, rtol=1e-4), "mismatch vs reference"

    print("KERNEL_OK")
</pallas_src>

<mosaic_0001>
module attributes {stable_mosaic.version = 11 : i64} {
  func.func @_input_linear_kernel(%arg0: i32, %arg1: i32, %arg2: memref<1x16x32xf32, #tpu.memory_space<vmem>>, %arg3: memref<32x32xf32, #tpu.memory_space<vmem>>, %arg4: memref<1x32xf32, #tpu.memory_space<vmem>>, %arg5: memref<1x32xf32, #tpu.memory_space<vmem>>, %arg6: memref<1x32xf32, #tpu.memory_space<vmem>>, %arg7: memref<16x32xf32, #tpu.memory_space<vmem>>, %arg8: memref<1x16x32xf32, #tpu.memory_space<vmem>>) attributes {dimension_semantics = [#tpu.dimension_semantics<parallel>, #tpu.dimension_semantics<parallel>], iteration_bounds = array<i64: 1, 2>, scalar_prefetch = 0 : i64, scratch_operands = 0 : i64, tpu.core_type = #tpu.core_type<tc>, window_params = [{transform_indices = @transform_0, window_bounds = array<i64: 1, 16, 32>}, {pipeline_mode = #tpu.pipeline_mode<synchronous>, transform_indices = @transform_1, window_bounds = array<i64: 32, 32>}, {pipeline_mode = #tpu.pipeline_mode<synchronous>, transform_indices = @transform_2, window_bounds = array<i64: 1, 32>}, {pipeline_mode = #tpu.pipeline_mode<synchronous>, transform_indices = @transform_3, window_bounds = array<i64: 1, 32>}, {pipeline_mode = #tpu.pipeline_mode<synchronous>, transform_indices = @transform_4, window_bounds = array<i64: 1, 32>}, {transform_indices = @transform_5, window_bounds = array<i64: 16, 32>}, {transform_indices = @transform_6, window_bounds = array<i64: 1, 16, 32>}]} {
    %c0 = arith.constant 0 : index
    %c0_0 = arith.constant 0 : index
    %c0_1 = arith.constant 0 : index
    %0 = vector.load %arg2[%c0, %c0_0, %c0_1] : memref<1x16x32xf32, #tpu.memory_space<vmem>>, vector<1x16x32xf32>
    %1 = vector.shape_cast %0 : vector<1x16x32xf32> to vector<16x32xf32>
    %c0_2 = arith.constant 0 : index
    %c0_3 = arith.constant 0 : index
    %2 = vector.load %arg3[%c0_2, %c0_3] : memref<32x32xf32, #tpu.memory_space<vmem>>, vector<32x32xf32>
    %cst = arith.constant dense<0.000000e+00> : vector<16x32xf32>
    %3 = tpu.matmul %1, %2, %cst {dimension_numbers = #tpu.dot_dimension_numbers<[1], [0], [0], [1], [0, 0, 1, 1], [], []>} : vector<16x32xf32>, vector<32x32xf32>, vector<16x32xf32> -> vector<16x32xf32>
    %c0_4 = arith.constant 0 : index
    %c0_5 = arith.constant 0 : index
    %4 = vector.load %arg4[%c0_4, %c0_5] : memref<1x32xf32, #tpu.memory_space<vmem>>, vector<1x32xf32>
    %5 = vector.broadcast %4 : vector<1x32xf32> to vector<16x32xf32>
    %6 = arith.addf %3, %5 : vector<16x32xf32>
    %cst_6 = arith.constant dense<0.000000e+00> : vector<16xf32>
    %7 = vector.multi_reduction <add>, %6, %cst_6 [1] : vector<16x32xf32> to vector<16xf32>
    %8 = vector.shape_cast %7 : vector<16xf32> to vector<16x1xf32>
    %cst_7 = arith.constant 3.200000e+01 : f32
    %9 = vector.broadcast %cst_7 : f32 to vector<16x1xf32>
    %10 = arith.divf %8, %9 : vector<16x1xf32>
    %11 = vector.broadcast %10 : vector<16x1xf32> to vector<16x32xf32>
    %12 = arith.subf %6, %11 : vector<16x32xf32>
    %13 = arith.mulf %12, %12 : vector<16x32xf32>
    %cst_8 = arith.constant dense<0.000000e+00> : vector<16xf32>
    %14 = vector.multi_reduction <add>, %13, %cst_8 [1] : vector<16x32xf32> to vector<16xf32>
    %15 = vector.shape_cast %14 : vector<16xf32> to vector<16x1xf32>
    %cst_9 = arith.constant 3.200000e+01 : f32
    %16 = vector.broadcast %cst_9 : f32 to vector<16x1xf32>
    %17 = arith.divf %15, %16 : vector<16x1xf32>
    %cst_10 = arith.constant 9.99999996E-13 : f32
    %18 = vector.broadcast %cst_10 : f32 to vector<16x1xf32>
    %19 = arith.addf %17, %18 : vector<16x1xf32>
    %20 = math.rsqrt %19 : vector<16x1xf32>
    %21 = vector.broadcast %20 : vector<16x1xf32> to vector<16x32xf32>
    %22 = arith.mulf %12, %21 : vector<16x32xf32>
    %c0_11 = arith.constant 0 : index
    %c0_12 = arith.constant 0 : index
    %23 = vector.load %arg5[%c0_11, %c0_12] : memref<1x32xf32, #tpu.memory_space<vmem>>, vector<1x32xf32>
    %24 = vector.broadcast %23 : vector<1x32xf32> to vector<16x32xf32>
    %25 = arith.mulf %22, %24 : vector<16x32xf32>
    %c0_13 = arith.constant 0 : index
    %c0_14 = arith.constant 0 : index
    %26 = vector.load %arg6[%c0_13, %c0_14] : memref<1x32xf32, #tpu.memory_space<vmem>>, vector<1x32xf32>
    %27 = vector.broadcast %26 : vector<1x32xf32> to vector<16x32xf32>
    %28 = arith.addf %25, %27 : vector<16x32xf32>
    %c0_15 = arith.constant 0 : index
    %c0_16 = arith.constant 0 : index
    %29 = vector.load %arg7[%c0_15, %c0_16] : memref<16x32xf32, #tpu.memory_space<vmem>>, vector<16x32xf32>
    %30 = arith.addf %28, %29 : vector<16x32xf32>
    %c0_17 = arith.constant 0 : index
    %c0_18 = arith.constant 0 : index
    %c0_19 = arith.constant 0 : index
    %31 = vector.load %arg8[%c0_17, %c0_18, %c0_19] : memref<1x16x32xf32, #tpu.memory_space<vmem>>, vector<1x16x32xf32>
    %32 = vector.shape_cast %31 : vector<1x16x32xf32> to vector<16x32xf32>
    %33 = vector.shape_cast %30 : vector<16x32xf32> to vector<1x16x32xf32>
    tpu.vector_store %arg8[%c0_17, %c0_18, %c0_19], %33 {strides = array<i32>} : memref<1x16x32xf32, #tpu.memory_space<vmem>>, vector<1x16x32xf32>,
    return
  }
  func.func @transform_0(%arg0: i32, %arg1: i32) -> (i32, i32, i32) {
    %c0_i32 = arith.constant 0 : i32
    %c0_i32_0 = arith.constant 0 : i32
    return %arg1, %arg0, %c0_i32 : i32, i32, i32
  }
  func.func @transform_1(%arg0: i32, %arg1: i32) -> (i32, i32) {
    %c0_i32 = arith.constant 0 : i32
    %c0_i32_0 = arith.constant 0 : i32
    %c0_i32_1 = arith.constant 0 : i32
    return %c0_i32, %c0_i32_0 : i32, i32
  }
  func.func @transform_2(%arg0: i32, %arg1: i32) -> (i32, i32) {
    %c0_i32 = arith.constant 0 : i32
    %c0_i32_0 = arith.constant 0 : i32
    %c0_i32_1 = arith.constant 0 : i32
    return %c0_i32, %c0_i32_0 : i32, i32
  }
  func.func @transform_3(%arg0: i32, %arg1: i32) -> (i32, i32) {
    %c0_i32 = arith.constant 0 : i32
    %c0_i32_0 = arith.constant 0 : i32
    %c0_i32_1 = arith.constant 0 : i32
    return %c0_i32, %c0_i32_0 : i32, i32
  }
  func.func @transform_4(%arg0: i32, %arg1: i32) -> (i32, i32) {
    %c0_i32 = arith.constant 0 : i32
    %c0_i32_0 = arith.constant 0 : i32
    %c0_i32_1 = arith.constant 0 : i32
    return %c0_i32, %c0_i32_0 : i32, i32
  }
  func.func @transform_5(%arg0: i32, %arg1: i32) -> (i32, i32) {
    %c0_i32 = arith.constant 0 : i32
    %c0_i32_0 = arith.constant 0 : i32
    return %arg0, %c0_i32 : i32, i32
  }
  func.func @transform_6(%arg0: i32, %arg1: i32) -> (i32, i32, i32) {
    %c0_i32 = arith.constant 0 : i32
    %c0_i32_0 = arith.constant 0 : i32
    return %arg1, %arg0, %c0_i32 : i32, i32, i32
  }
}

</mosaic_0001>

<bundles_post_ra>
// kernel: tpu_custom_call.1
= control target key start
LH: loop header
LB: loop body
LE: loop exit
PB: predicated region body
PF: predicated region fallthrough
CT: control target
= control target key end

     0   :  { %s1089_s0 = inlined_call_operand.hbm [shape: f32[2,16,32], index: 0, kind: input, shape index: {}]   ;;  %s1090_s1 = inlined_call_operand.hbm [shape: f32[32,32], index: 1, kind: input, shape index: {}]   ;;  %s1091_s2 = inlined_call_operand.vmem [shape: f32[1,32], index: 2, kind: input, shape index: {}]   ;;  %s1092_s3 = inlined_call_operand.vmem [shape: f32[1,32], index: 3, kind: input, shape index: {}]   ;;  %s1093_s4 = inlined_call_operand.vmem [shape: f32[1,32], index: 4, kind: input, shape index: {}]   ;;  %s1094_s5 = inlined_call_operand.hbm [shape: f32[16,32], index: 5, kind: input, shape index: {}]   ;;  %s1095_s6 = inlined_call_operand.hbm [shape: f32[2,16,32], index: 6, kind: output, shape index: {}]  }
   0x1   :  { %1099 = sst [smem:[#allocation13_spill]] %s1090_s1 }
   0x2   :  { %1100 = sst [smem:[#allocation14_spill]] %s1094_s5 }
   0x3   :  { %11 = vsyncpa [#allocation3], 0 }
   0x4   :  { %13 = vsyncpa [#allocation3 + $0x1], 0 }
   0x5   :  { %14 = vsyncpa [#allocation6], 0 }
   0x6   :  { %15 = vsyncpa [#allocation4], 0 }
   0x7   :  { %17 = vsyncpa [#allocation4 + $0x1], 0  ;;  %s913_s21 = smov 0   ;;  %s915_s22 = smov 0  }
   0x8   :  { %s917_s23 = smov 0   ;;  %s919_s24 = smov 0  }
   0x9   :  { %s921_s25 = smov 0   ;;  %s923_s26 = smov 0  }
   0xa LB: > { %s569_s27 = sadd.s32 4294967295, %s869_s26   ;;  %s570_s28 = sadd.s32 4294967294, %s869_s26   ;;  %s869_s26 = sphi %s923_s26, %s23_s26   ;;  %s865_s25 = sphi %s921_s25, %s1116_s25   ;;  %s861_s24 = sphi %s919_s24, %s1115_s24   ;;  %s857_s23 = sphi %s917_s23, %s1114_s23   ;;  %s853_s22 = sphi %s915_s22, %s1113_s22   ;;  %s849_s21 = sphi %s913_s21, %s1112_s21  }
   0xb   : > { %p57_p0 = scmp.ne.s32.totalorder %s853_s22, %s849_s21  ;;  %p949_p1 = scmp.eq.s32.totalorder %s569_s27, 0 }
   0xc   : > { %p199_p2 = scmp.eq.s32.totalorder %s570_s28, 1  ;;  %p571_p4 = scmp.ge.s32.totalorder %s869_s26, 1 }
   0xd   : > { %p955_p3 = por %p949_p1, %p57_p0  ;;  %p206_p6 = scmp.lt.s32.totalorder %s869_s26, 3 }
   0xe   : > { %p960_p5 = por %p199_p2, %p57_p0  ;;  %s1104_s1 = sld [smem:[#allocation13_spill]] }
   0xf   : > { %p968_p7 = pnand %p571_p4, %p206_p6  ;;  %s871_s12 = smov [#allocation5]  }
  0x10   : > { %s219_s13 = sshll.u32 %s871_s12, 4  ;;  %p574_p10 = scmp.ge.s32.totalorder %s869_s26, 2  ;;  %s220_s13 = int_to_ptr.vmem [resolvable:$true] %s219_s13 }
  0x11   : > { %p608_p8 = pneg %p968_p7  ;;  %s1106_s5 = sld [smem:[#allocation14_spill]] }
  0x12   : > { %s1096_s17 = smov 128   ;;  %s1097_s18 = smov 8  }
  0x13   : > { %p609_p9 = pnand %p608_p8, %p949_p1  ;;  %s874_s19 = smov [#allocation7]  }
  0x14   : > { %s217_s10 = sshll.u32 %s1104_s1, 4  ;;  %s245_s20 = sshll.u32 %s874_s19, 4  ;;  %s218_s10 = int_to_ptr.hbm [resolvable:$true] %s217_s10  ;;  %s246_s20 = int_to_ptr.vmem [resolvable:$true] %s245_s20 }
  0x15   : > { %611 = dma.hbm_to_vmem [thread:$0]  (!%p609_p9), %s218_s10, 512, %s220_s13, [#allocation6], %s1096_s17, %s1096_s17, %s1097_s18  }
  0x16   : > { %p193_p11 = scmp.eq.s32.totalorder %s569_s27, 1  ;;  %s32_s28 = sadd.s32 1, %s865_s25 }
  0x17   : > { %s243_s16 = sshll.u32 %s1106_s5, 4  ;;  %p33_p12 = scmp.ge.s32.totalorder %s32_s28, 2  ;;  %s244_s16 = int_to_ptr.hbm [resolvable:$true] %s243_s16 }
  0x18   : > { %614 = dma.hbm_to_vmem [thread:$0]  (!%p609_p9), %s244_s16, 256, %s246_s20, [#allocation6], %s1096_s17, %s1096_s17, %s1097_s18  }
  0x19   : > { %s44_s8 = sadd.s32 1, %s857_s23  ;;  %p51_p13 = scmp.ne.s32.totalorder %s857_s23, %s853_s22 }
  0x1a   : > { %p52_p0 = scmp.eq.s32.totalorder %s869_s26, 0  ;;  %s1118_s28 = smov (%p33_p12, %s32_s28), 0 }
  0x1b   : > { %1107 = sst [smem:[#allocation12_spill]] %s1118_s28  ;;  %p995_p2 = por %p193_p11, %p51_p13 }
  0x1c   : > { %p625_p4 = scmp.lt.s32.totalorder %s869_s26, 2  ;;  %s39_s10 = ssub.s32 %s865_s25, %s1118_s28 }
  0x1d   : > { %s259_s12 = sand.u32 1, %s857_s23   ;;  %p42_p6 = scmp.eq.s32.totalorder %s39_s10, 0 }
  0x1e   : > { %p53_p8 = por %p52_p0, %p51_p13  ;;  %s575_s13 = sshll.u32 %s259_s12, 4 }
  0x1f   : > { %s590_s27 = sshll.u32 %s865_s25, 4  ;;  %s263_s17 = scalar_lea.vmem [#allocation2], %s575_s13 }
  0x20   : > { %s1005_s14 = scalar_select %p42_p6, %s857_s23, %s44_s8  }
  0x21   : > { %s270_s19 = scalar_lea.hbm %s1089_s0, %s590_s27  ;;  %s273_s18 = sshll.u32 %s263_s17, 4  ;;  %s274_s18 = int_to_ptr.vmem [resolvable:$true] %s273_s18 }
  0x22   : > { %s271_s20 = sshll.u32 %s270_s19, 4  ;;  %p616_p9 = pnand %p625_p4, %p53_p8  ;;  %s272_s20 = int_to_ptr.hbm [resolvable:$true] %s271_s20 }
  0x23   : > { %s260_s1 = scalar_lea.sflag [#allocation3], %s259_s12  ;;  %s1109_s5 = smov 8  }
  0x24   : > { %s1110_s28 = smov 128   ;;  %285 = sbr.rel (%p968_p7) target bundleno = 462 (0x1ce), region = 44 }
  0x25   : > { %618 = dma.hbm_to_vmem [thread:$0]  (!%p616_p9), %s272_s20, 256, %s274_s18, %s260_s1, %s1110_s28, %s1110_s28, %s1109_s5  }
  0x26   : > { %s1018_s8 = sand.u32 (!%p968_p7), 1, %s853_s22  }
  0x27   : > { %s579_s17 = sshll.u32 (!%p968_p7), %s1018_s8, 4  ;;  %s288_s10 = scalar_lea.sflag (!%p968_p7), [#allocation3], %s1018_s8 }
  0x28   : > { %s291_s13 = scalar_lea.vmem (!%p968_p7), [#allocation2], %s579_s17 }
  0x29   : > { %836 = dma.done.wait (%p955_p3), %s288_s10, 256  }
  0x2a   : > { %838 = vsyncadd (%p955_p3), %s288_s10, 4294967040 }
  0x2b   : > { %840 = dma.done.wait (%p949_p1), [#allocation6], 768  }
  0x2c   : > { %842 = vsyncadd (%p949_p1), [#allocation6], 4294966528  ;;  %v339_v0 = vld [vmem:[#allocation5 + $0x18] sm:$0xff]  ;;  %v338_v1 = vld [vmem:[#allocation5 + $0x10] sm:$0xff]  ;;  %vm344_vm0 = vcmask 261120   ;;  %v875_v13 = vmov 32.0  }
  0x2d   : > { %363 = vmatpush.msra.mxu0 %v339_v0  ;;  %592 = vmatpush.msra.mxu1 %v339_v0  ;;  %v337_v2 = vld [vmem:[#allocation5 + $0x8] sm:$0xff]  ;;  %v336_v3 = vld [vmem:[#allocation5] sm:$0xff]  ;;  %687 = vrcp.f32 %v875_v13  ;;  %s591_s28 = sshll.u32 %s861_s24, 4  ;;  %s330_s16 = scalar_lea.vmem [#allocation8], %s579_s17 }
  0x2e   : > { %v334_v4 = vld [vmem:[%s291_s13] sm:$0xff]  ;;  %v335_v5 = vld [vmem:[%s291_s13 + $0x8] sm:$0xff]  ;;  %s457_s15 = scalar_lea.hbm %s1095_s6, %s591_s28  ;;  %s458_s19 = sshll.u32 %s330_s16, 4  ;;  %s459_s19 = int_to_ptr.vmem [resolvable:$true] %s458_s19 }
  0x2f   : > { %364 = vmatpush.msra.mxu0 %v338_v1  ;;  %593 = vmatpush.msra.mxu1 %v338_v1  ;;  %v684_v6 = vld [vmem:[%s1091_s2] ss:$0 sm:$0xff]  ;;  %s460_s20 = sshll.u32 %s457_s15, 4  ;;  %v438_v59 = vld [vmem:[#allocation7 + $0x8] sm:$0xff]  ;;  %s444_s24 = scalar_lea.sflag [#allocation4], %s1018_s8  ;;  %s461_s20 = int_to_ptr.hbm [resolvable:$true] %s460_s20 }
  0x30   : > { %v685_v44 = vld [vmem:[%s1092_s3] ss:$0 sm:$0xff]  ;;  %s797_s10 = sshra.s32 %s461_s20, 4  ;;  %s803_s5 = scalar_lea.hbm %s1095_s6, 32  ;;  %s798_s10 = int_to_ptr.hbm [resolvable:$true] %s797_s10 }
  0x31   : > { %365 = vmatpush.msra.mxu0 %v337_v2  ;;  %594 = vmatpush.msra.mxu1 %v337_v2  ;;  %v686_v47 = vld [vmem:[%s1093_s4] ss:$0 sm:$0xff]  ;;  %s799_s13 = scalar_lea.hbm %s798_s10, 16  ;;  %p804_p11 = scmp.lt.s32.totalorder %s798_s10, %s1095_s6 }
  0x32   : > { %v437_v51 = vld [vmem:[#allocation7] sm:$0xff]  ;;  %p800_p1 = scmp.ne.s32.totalorder %s798_s10, %s799_s13  ;;  %p805_p12 = scmp.lt.s32.totalorder %s803_s5, %s799_s13 }
  0x33   : > { %366 = vmatpush.msra.mxu0 %v336_v3  ;;  %595 = vmatpush.msra.mxu1 %v336_v3  ;;  %v688_v14 = vpop.eup %687 }
  0x34   : > { %583 = vmatmul.msk.f32.vlgmr.msra.gmra.mxu0 %vm344_vm0, %v334_v4  ;;  %584 = vmatmul.msk.f32.vlgmr.msra.gmra.mxu1 %vm344_vm0, %v335_v5  ;;  %v381_v15 = vmul.f32 32.0, %v688_v14  ;;  %vm385_vm1 = vweird.f32 %v688_v14  ;;  %p801_p3 = pnand %p800_p1, %p995_p2  ;;  %p806_p13 = por %p805_p12, %p804_p11 }
  0x36   : > { %v382_v16 = vsub.f32 1.0, %v381_v15  ;;  %p802_p7 = pneg %p801_p3 }
  0x38   : > { %v383_v17 = vmul.f32 %v688_v14, %v382_v16  ;;  %p807_p0 = pnand %p806_p13, %p802_p7 }
  0x3a   : > { %v384_v18 = vadd.f32 %v688_v14, %v383_v17 }
  0x3c   : > { %v386_v19 = vsel %vm385_vm1, %v688_v14, %v384_v18 }
  0xb1   : > { %v368_v7 = vpop.f32.mrf.mxu0  ;;  %v371_v9 = vpop.f32.mrf.mxu1 }
  0xb2   : > { %v369_v8 = vadd.f32 %v684_v6, %v368_v7  ;;  %v372_v11 = vadd.f32 %v684_v6, %v371_v9 }
  0xb4   : > { %v374_v10 = vsel %vm344_vm0, %v369_v8, 0.0  ;;  %v377_v12 = vsel %vm344_vm0, %v372_v11, 0.0 }
  0xb5   : > { %375 = vadd.xlane.f32.xlu0 %v374_v10 }
  0xbd   : > { %378 = vadd.xlane.f32.xlu0 %v377_v12 }
 0x128   : > { %v376_v20 = vpop.xlane.xlu0 %375 }
 0x129   : > { %v387_v21 = vmul.f32 %v386_v19, %v376_v20 }
 0x12b   : > { %v389_v22 = vsub.f32 %v369_v8, %v387_v21 }
 0x12d   : > { %v391_v23 = vmul.f32 %v389_v22, %v389_v22 }
 0x12f   : > { %v393_v24 = vsel %vm344_vm0, %v391_v23, 0.0 }
 0x130   : > { %394 = vadd.xlane.f32.xlu1 %v393_v24  ;;  %v379_v25 = vpop.xlane.xlu0 %378 }
 0x131   : > { %v388_v26 = vmul.f32 %v386_v19, %v379_v25 }
 0x133   : > { %v390_v27 = vsub.f32 %v372_v11, %v388_v26 }
 0x135   : > { %v392_v28 = vmul.f32 %v390_v27, %v390_v27 }
 0x137   : > { %v396_v29 = vsel %vm344_vm0, %v392_v28, 0.0 }
 0x138   : > { %397 = vadd.xlane.f32.xlu1 %v396_v29 }
 0x1a3   : > { %v395_v30 = vpop.xlane.xlu1 %394 }
 0x1a4   : > { %v399_v31 = vmul.f32 %v395_v30, %v386_v19 }
 0x1a6   : > { %v401_v32 = vadd.f32 1e-12, %v399_v31 }
 0x1a8   : > { %689 = vrsqrt.f32 %v401_v32  ;;  %vm409_vm3 = vweird.f32 %v401_v32 }
 0x1ab   : > { %v398_v33 = vpop.xlane.xlu1 %397 }
 0x1ac   : > { %v400_v34 = vmul.f32 %v398_v33, %v386_v19 }
 0x1ae   : > { %v690_v35 = vpop.eup %689  ;;  %v402_v36 = vadd.f32 1e-12, %v400_v34 }
 0x1af   : > { %v404_v37 = vmul.f32 %v690_v35, %v401_v32  ;;  %vm410_vm2 = vweird.f32 %v690_v35 }
 0x1b0   : > { %691 = vrsqrt.f32 %v402_v36  ;;  %vm411_vm4 = vmor %vm409_vm3, %vm410_vm2  ;;  %vm419_vm6 = vweird.f32 %v402_v36 }
 0x1b1   : > { %v405_v38 = vmul.f32 %v690_v35, %v404_v37 }
 0x1b3   : > { %v406_v39 = vmul.f32 0.5, %v405_v38 }
 0x1b5   : > { %v407_v40 = vsub.f32 1.5, %v406_v39 }
 0x1b6   : > { %v692_v41 = vpop.eup %691 }
 0x1b7   : > { %v408_v42 = vmul.f32 %v690_v35, %v407_v40  ;;  %v414_v43 = vmul.f32 %v692_v41, %v402_v36  ;;  %vm420_vm5 = vweird.f32 %v692_v41 }
 0x1b8   : > { %vm421_vm7 = vmor %vm419_vm6, %vm420_vm5 }
 0x1b9   : > { %v412_v45 = vsel %vm411_vm4, %v690_v35, %v408_v42  ;;  %v415_v46 = vmul.f32 %v692_v41, %v414_v43 }
 0x1ba   : > { %v423_v48 = vmul.f32 %v412_v45, %v389_v22 }
 0x1bb   : > { %v416_v49 = vmul.f32 0.5, %v415_v46 }
 0x1bc   : > { %v429_v50 = vmul.f32 %v685_v44, %v423_v48 }
 0x1bd   : > { %v417_v52 = vsub.f32 1.5, %v416_v49 }
 0x1be   : > { %v435_v53 = vadd.f32 %v686_v47, %v429_v50 }
 0x1bf   : > { %v418_v54 = vmul.f32 %v692_v41, %v417_v52 }
 0x1c0   : > { %v439_v55 = vadd.f32 %v437_v51, %v435_v53 }
 0x1c1   : > { %v422_v56 = vsel %vm421_vm7, %v692_v41, %v418_v54 }
 0x1c2   : > { %v424_v57 = vmul.f32 %v422_v56, %v390_v27  ;;  %441 = vst.msk [vmem:[%s330_s16] sm:$0xff] %vm344_vm0, %v439_v55 }
 0x1c4   : > { %v430_v58 = vmul.f32 %v685_v44, %v424_v57 }
 0x1c6   : > { %v436_v60 = vadd.f32 %v686_v47, %v430_v58 }
 0x1c8   : > { %v440_v61 = vadd.f32 %v438_v59, %v436_v60 }
 0x1ca   : > { %442 = vst.msk [vmem:[%s330_s16 + $0x8] sm:$0xff] %vm344_vm0, %v440_v61 }
 0x1cb   : > { %810 = shalt.err (!%p807_p0)
}
 0x1cc   : > { %s876_s8 = smov 128   ;;  %s877_s11 = smov 8  }
 0x1cd   : > { %606 = dma.vmem_to_hbm [thread:$0]  (%p995_p2), %s459_s19, 256, %s461_s20, %s444_s24, %s876_s8, %s876_s8, %s877_s11  }
 0x1ce PF: > { %s475_s18 = sand.u32 1, %s849_s21   ;;  %p620_p4 = pnand %p574_p10, %p960_p5 }
 0x1cf   : > { %s476_s28 = scalar_lea.sflag [#allocation4], %s475_s18 }
 0x1d0   : > { %p621_p6 = pneg %p620_p4 }
 0x1d2   : > { %844 = dma.done.wait (%p621_p6), %s476_s28, 256  }
 0x1d3   : > { %846 = vsyncadd (%p621_p6), %s476_s28, 4294967040  ;;  %s23_s26 = sadd.s32 1, %s869_s26   ;;  %s1111_s9 = sld [smem:[#allocation12_spill]] }
 0x1d4   : > { %p20_p8 = scmp.ge.s32.totalorder %s23_s26, 4   ;;  %s1112_s21 = smov %s853_s22 }
 0x1d5   : > { %s1113_s22 = smov %s857_s23  ;;  %s1114_s23 = smov %s1005_s14 }
 0x1d6   : > { %s1115_s24 = smov %s865_s25  ;;  %22 = sbr.rel (!%p20_p8) target bundleno = 10 (0xa), region = 98 }
 0x1d9   : > { %s1116_s25 = smov %s1111_s9 }
 0x1db   :  { %482 = vsyncpa [#allocation3], 1 }
 0x1dc   :  { %484 = vsyncpa [#allocation3 + $0x1], 1 }
 0x1dd   :  { %485 = vsyncpa [#allocation6], 1 }
 0x1de   :  { %486 = vsyncpa [#allocation4], 1 }
 0x1df   :  { %488 = vsyncpa [#allocation4 + $0x1], 1 }

</bundles_post_ra>
